<compile_context>
chip_gen: v5e
topology: v5e:2x2
jax: 0.10.0
libtpu: 0.0.40
codegen_flags: <defaults>
</compile_context>

<pallas_src>
import jax
import jax.numpy as jnp
from jax.experimental import pallas as pl
from jax.experimental.pallas import tpu as pltpu


def _round_up(x, m):
    return ((x + m - 1) // m) * m


def _cosine_sim_kernel(pred_ref, tgt_ref, cs_ref):
    """One (TB, D) batch tile -> (TB, 1) cosine-similarity column."""
    p = pred_ref[...].astype(jnp.float32)            # (TB, D)
    t = tgt_ref[...].astype(jnp.float32)             # (TB, D)

    dot = jnp.sum(p * t, axis=-1, keepdims=True)     # (TB, 1)
    p2 = jnp.sum(p * p, axis=-1, keepdims=True)      # (TB, 1)
    t2 = jnp.sum(t * t, axis=-1, keepdims=True)      # (TB, 1)

    # F.cosine_similarity clamps the denominator at eps=1e-8:
    #   cs = dot / max(|p|*|t|, eps) == dot * rsqrt(max(p2*t2, eps^2))
    # Single EUP rsqrt instead of two sqrts + a divide.
    cs_ref[...] = dot * jax.lax.rsqrt(jnp.maximum(p2 * t2, jnp.float32(1e-16)))


def _pick_tile(batch, row_bytes, sublane, vmem_budget_bytes=16 * 1024 * 1024):
    """Rows per grid step: biggest tile whose double-buffered inputs fit the budget."""
    # 2 pipeline buffers x (predicted + target) rows of `row_bytes` each.
    tb = vmem_budget_bytes // max(1, 2 * row_bytes)
    tb = int(max(sublane, min(4096, tb)))
    tb = (tb // sublane) * sublane
    # v7x: keep at least two grid steps so the "parallel" batch axis can shard
    # across both TensorCores (neutral on single-TC v5e/v6e).
    if batch >= 2 * sublane:
        tb = min(tb, _round_up((batch + 1) // 2, sublane))
    tb = min(tb, _round_up(batch, sublane))
    return max(sublane, tb)


def _input_block_spec(tile_b, feat, triple_buffer):
    index_map = lambda i: (i, 0)
    if triple_buffer and hasattr(pl, "Buffered"):
        try:
            return pl.BlockSpec((tile_b, feat), index_map,
                                pipeline_mode=pl.Buffered(3))
        except TypeError:  # older BlockSpec without pipeline_mode
            pass
    return pl.BlockSpec((tile_b, feat), index_map)


def cosine_similarity_loss(predicted, target, labels, margin, *, tile_b=None):
    """predicted/target: (B, D); labels: (B,). Returns (scalar loss, bool (B,))."""
    B, D = predicted.shape
    assert target.shape == (B, D)

    it_p = jnp.dtype(predicted.dtype).itemsize
    it_t = jnp.dtype(target.dtype).itemsize
    # Packed-sublane multiple for the narrowest input dtype (8 f32/16 bf16/32 i8).
    sublane = max(8, 32 // min(it_p, it_t))
    row_bytes = D * (it_p + it_t)

    if tile_b is None:
        tile_b = _pick_tile(B, row_bytes, sublane)
    tile_b = max(sublane, (int(tile_b) // sublane) * sublane)
    tile_b = min(tile_b, _round_up(B, sublane))

    num_tiles = pl.cdiv(B, tile_b)

    # Triple-buffer the big input DMAs only when tiles are forced small enough
    # that per-step DMA time approaches the fixed per-step overhead.
    small_tiles = (tile_b * row_bytes < (256 << 10)) and num_tiles >= 3
    n_buf = 3 if small_tiles else 2

    # Raise the scoped VMEM limit past v5e's 16 MiB default; stays well inside
    # v7x's 64 MiB physical VMEM.
    est_vmem = n_buf * tile_b * row_bytes + 2 * tile_b * 4
    vmem_limit = int(min(max(est_vmem + (8 << 20), 32 << 20), 64 << 20))

    cs_col = pl.pallas_call(
        _cosine_sim_kernel,
        out_shape=jax.ShapeDtypeStruct((B, 1), jnp.float32),
        grid=(num_tiles,),
        in_specs=[
            _input_block_spec(tile_b, D, small_tiles),
            _input_block_spec(tile_b, D, small_tiles),
        ],
        out_specs=pl.BlockSpec((tile_b, 1), lambda i: (i, 0)),
        compiler_params=pltpu.CompilerParams(
            dimension_semantics=("parallel",),
            vmem_limit_bytes=vmem_limit,
        ),
    )(predicted, target)

    cs = cs_col[:, 0]                                  # (B,)
    labels_f = labels.astype(jnp.float32)
    # O(B) epilogue, fused by XLA; margin stays outside the compiled kernel so
    # sweeping it never triggers a recompile.
    loss = jnp.mean(labels_f * (1.0 - cs) + (1.0 - labels_f) * (1.0 + cs))
    predictions = cs > jnp.asarray(margin, jnp.float32)
    return loss, predictions


def _reference(predicted, target, labels):
    """Pure-JAX reference mirroring F.cosine_similarity + the loss formula."""
    p = predicted.astype(jnp.float32)
    t = target.astype(jnp.float32)
    dot = jnp.sum(p * t, axis=-1)
    denom = jnp.maximum(
        jnp.linalg.norm(p, axis=-1) * jnp.linalg.norm(t, axis=-1), 1e-8)
    cs = dot / denom
    labels_f = labels.astype(jnp.float32)
    loss = jnp.mean(labels_f * (1 - cs) + (1 - labels_f) * (1 + cs))
    return loss, cs


def _check(predicted, target, labels, margin, **kw):
    loss, predictions = cosine_similarity_loss(predicted, target, labels,
                                               margin, **kw)
    jax.block_until_ready((loss, predictions))
    loss_ref, cs_ref = _reference(predicted, target, labels)
    assert jnp.allclose(loss, loss_ref, atol=1e-5, rtol=1e-5), (loss, loss_ref)
    pred_ref = cs_ref > margin
    near_margin = jnp.abs(cs_ref - margin) < 1e-5
    assert bool(jnp.all((predictions == pred_ref) | near_margin))


if __name__ == "__main__":
    # Test 1: small embedding-pair batch (single tile, full-block path).
    B, D = 8, 128
    k1, k2, k3 = jax.random.split(jax.random.PRNGKey(0), 3)
    predicted = jax.random.normal(k1, (B, D), dtype=jnp.float32)
    target = jax.random.normal(k2, (B, D), dtype=jnp.float32)
    labels = jax.random.bernoulli(k3, 0.5, (B,)).astype(jnp.float32)
    _check(predicted, target, labels, margin=0.5)

    # Test 2: ragged batch + forced-small tiles (partial final block without any
    # input padding, multi-step grid, triple-buffered input path).
    B2 = 37
    k4, k5, k6 = jax.random.split(jax.random.PRNGKey(1), 3)
    predicted2 = jax.random.normal(k4, (B2, D), dtype=jnp.float32)
    target2 = jax.random.normal(k5, (B2, D), dtype=jnp.float32)
    labels2 = jax.random.bernoulli(k6, 0.5, (B2,)).astype(jnp.float32)
    _check(predicted2, target2, labels2, margin=0.1, tile_b=8)

    # Test 3: bf16 inputs + default tile picker (2-way "parallel" grid, ragged).
    B3, D3 = 300, 256
    k7, k8, k9 = jax.random.split(jax.random.PRNGKey(2), 3)
    predicted3 = jax.random.normal(k7, (B3, D3), dtype=jnp.float32).astype(jnp.bfloat16)
    target3 = jax.random.normal(k8, (B3, D3), dtype=jnp.float32).astype(jnp.bfloat16)
    labels3 = jax.random.bernoulli(k9, 0.5, (B3,)).astype(jnp.float32)
    _check(predicted3, target3, labels3, margin=0.0)

    print("KERNEL_OK")
</pallas_src>

<mosaic_0001>
module attributes {stable_mosaic.version = 11 : i64} {
  func.func @_cosine_sim_kernel(%arg0: i32, %arg1: memref<8x128xf32, #tpu.memory_space<vmem>>, %arg2: memref<8x128xf32, #tpu.memory_space<vmem>>, %arg3: memref<8x1xf32, #tpu.memory_space<vmem>>) attributes {dimension_semantics = [#tpu.dimension_semantics<parallel>], iteration_bounds = array<i64: 1>, scalar_prefetch = 0 : i64, scratch_operands = 0 : i64, tpu.core_type = #tpu.core_type<tc>, window_params = [{transform_indices = @transform_0, window_bounds = array<i64: 8, 128>}, {transform_indices = @transform_1, window_bounds = array<i64: 8, 128>}, {transform_indices = @transform_2, window_bounds = array<i64: 8, 1>}]} {
    %c0 = arith.constant 0 : index
    %c0_0 = arith.constant 0 : index
    %0 = vector.load %arg1[%c0, %c0_0] : memref<8x128xf32, #tpu.memory_space<vmem>>, vector<8x128xf32>
    %c0_1 = arith.constant 0 : index
    %c0_2 = arith.constant 0 : index
    %1 = vector.load %arg2[%c0_1, %c0_2] : memref<8x128xf32, #tpu.memory_space<vmem>>, vector<8x128xf32>
    %2 = arith.mulf %0, %1 : vector<8x128xf32>
    %cst = arith.constant dense<0.000000e+00> : vector<8xf32>
    %3 = vector.multi_reduction <add>, %2, %cst [1] : vector<8x128xf32> to vector<8xf32>
    %4 = vector.shape_cast %3 : vector<8xf32> to vector<8x1xf32>
    %5 = arith.mulf %0, %0 : vector<8x128xf32>
    %cst_3 = arith.constant dense<0.000000e+00> : vector<8xf32>
    %6 = vector.multi_reduction <add>, %5, %cst_3 [1] : vector<8x128xf32> to vector<8xf32>
    %7 = vector.shape_cast %6 : vector<8xf32> to vector<8x1xf32>
    %8 = arith.mulf %1, %1 : vector<8x128xf32>
    %cst_4 = arith.constant dense<0.000000e+00> : vector<8xf32>
    %9 = vector.multi_reduction <add>, %8, %cst_4 [1] : vector<8x128xf32> to vector<8xf32>
    %10 = vector.shape_cast %9 : vector<8xf32> to vector<8x1xf32>
    %11 = arith.mulf %7, %10 : vector<8x1xf32>
    %cst_5 = arith.constant 1.000000e-16 : f32
    %12 = vector.broadcast %cst_5 : f32 to vector<8x1xf32>
    %13 = arith.maximumf %11, %12 : vector<8x1xf32>
    %14 = math.rsqrt %13 : vector<8x1xf32>
    %15 = arith.mulf %4, %14 : vector<8x1xf32>
    %c0_6 = arith.constant 0 : index
    %c0_7 = arith.constant 0 : index
    %16 = vector.load %arg3[%c0_6, %c0_7] : memref<8x1xf32, #tpu.memory_space<vmem>>, vector<8x1xf32>
    tpu.vector_store %arg3[%c0_6, %c0_7], %15 {strides = array<i32>} : memref<8x1xf32, #tpu.memory_space<vmem>>, vector<8x1xf32>,
    return
  }
  func.func @transform_0(%arg0: i32) -> (i32, i32) {
    %c0_i32 = arith.constant 0 : i32
    %c0_i32_0 = arith.constant 0 : i32
    return %arg0, %c0_i32 : i32, i32
  }
  func.func @transform_1(%arg0: i32) -> (i32, i32) {
    %c0_i32 = arith.constant 0 : i32
    %c0_i32_0 = arith.constant 0 : i32
    return %arg0, %c0_i32 : i32, i32
  }
  func.func @transform_2(%arg0: i32) -> (i32, i32) {
    %c0_i32 = arith.constant 0 : i32
    %c0_i32_0 = arith.constant 0 : i32
    return %arg0, %c0_i32 : i32, i32
  }
}

</mosaic_0001>

<bundles_post_ra>
// kernel: tpu_custom_call.1
= control target key start
LH: loop header
LB: loop body
LE: loop exit
PB: predicated region body
PF: predicated region fallthrough
CT: control target
= control target key end

     0   :  { %7 = vsyncpa [#allocation3], 0  ;;  %s153_s0 = inlined_call_operand.hbm [shape: f32[8,128], index: 0, kind: input, shape index: {}]   ;;  %s154_s1 = inlined_call_operand.hbm [shape: f32[8,128], index: 1, kind: input, shape index: {}]   ;;  %s155_s2 = inlined_call_operand.vmem [shape: f32[8,1], index: 2, kind: output, shape index: {}]  }
   0x1   :  { %s14_s11 = sshll.u32 %s153_s0, 4  ;;  %s15_s11 = int_to_ptr.hbm [resolvable:$true] %s14_s11 }
   0x2   :  { %8 = vsyncpa [#allocation5], 0  ;;  %s127_s12 = smov [#allocation2]   ;;  %s25_s16 = sshll.u32 %s154_s1, 4  ;;  %s26_s16 = int_to_ptr.hbm [resolvable:$true] %s25_s16 }
   0x3   :  { %s16_s13 = sshll.u32 %s127_s12, 4  ;;  %s128_s17 = smov [#allocation4]   ;;  %s17_s13 = int_to_ptr.vmem [resolvable:$true] %s16_s13 }
   0x4   :  { %19 = dma.hbm_to_vmem [thread:$0]  %s15_s11, 128, %s17_s13, [#allocation3]  }
   0x5   :  { %s27_s18 = sshll.u32 %s128_s17, 4  ;;  %s28_s18 = int_to_ptr.vmem [resolvable:$true] %s27_s18 }
   0x6   :  { %30 = dma.hbm_to_vmem [thread:$0]  %s26_s16, 128, %s28_s18, [#allocation5]  }
   0x7   :  { %123 = dma.done.wait [#allocation3], 128  }
   0x8   :  { %124 = vsyncadd [#allocation3], 4294967168 }
   0x9   :  { %125 = dma.done.wait [#allocation5], 128  }
   0xa   :  { %126 = vsyncadd [#allocation5], 4294967168  ;;  %v39_v0 = vld [vmem:[#allocation2] sm:$0xff]  ;;  %v40_v1 = vld [vmem:[#allocation4] sm:$0xff]  ;;  %vm63_vm3 = vcmask 7168  }
   0xb   :  { %v44_v2 = vmul.f32 %v39_v0, %v39_v0  ;;  %v41_v3 = vmul.f32 %v40_v1, %v39_v0  ;;  %v47_v4 = vmul.f32 %v40_v1, %v40_v1 }
   0xd   :  { %45 = vadd.xlane.f32.xlu0 %v44_v2  ;;  %42 = vadd.xlane.f32.xlu1 %v41_v3 }
  0x15   :  { %48 = vadd.xlane.f32.xlu0 %v47_v4 }
  0x80   :  { %v46_v5 = vpop.xlane.xlu0 %45  ;;  %v43_v15 = vpop.xlane.xlu1 %42 }
  0x88   :  { %v49_v6 = vpop.xlane.xlu0 %48 }
  0x89   :  { %v50_v7 = vmul.f32 %v49_v6, %v46_v5 }
  0x8b   :  { %v51_v8 = vmax.f32 %v50_v7, 1e-16 }
  0x8d   :  { %73 = vrsqrt.f32 %v51_v8  ;;  %vm58_vm1 = vweird.f32 %v51_v8 }
  0x93   :  { %v74_v9 = vpop.eup %73 }
  0x94   :  { %v53_v10 = vmul.f32 %v74_v9, %v51_v8  ;;  %vm59_vm0 = vweird.f32 %v74_v9 }
  0x95   :  { %vm60_vm2 = vmor %vm58_vm1, %vm59_vm0 }
  0x96   :  { %v54_v11 = vmul.f32 %v74_v9, %v53_v10 }
  0x98   :  { %v55_v12 = vmul.f32 0.5, %v54_v11 }
  0x9a   :  { %v56_v13 = vsub.f32 1.5, %v55_v12 }
  0x9c   :  { %v57_v14 = vmul.f32 %v74_v9, %v56_v13 }
  0x9e   :  { %v61_v16 = vsel %vm60_vm2, %v74_v9, %v57_v14 }
  0x9f   :  { %v62_v17 = vmul.f32 %v61_v16, %v43_v15 }
  0xa1   :  { %64 = vst.msk [vmem:[%s155_s2] sm:$0xff] %vm63_vm3, %v62_v17 }
  0xa2   :  { %69 = vsyncpa [#allocation3], 1 }
  0xa3   :  { %70 = vsyncpa [#allocation5], 1 }

</bundles_post_ra>
